<compile_context>
chip_gen: v5e
topology: v5e:2x2
jax: 0.10.0
libtpu: 0.0.40
codegen_flags: <defaults>
</compile_context>

<pallas_src>
import functools

import jax
import jax.numpy as jnp
from jax.experimental import pallas as pl
from jax.experimental.pallas import tpu as pltpu


# ----------------------------- kernel 1: node-wise MLP ------------------------------

def mlp_kernel(x_ref, w1_ref, b1_ref, w2_ref, b2_ref, f_ref):
    x = x_ref[...]                                                      # [tm, in_dim]
    h1 = jnp.dot(x, w1_ref[...], preferred_element_type=jnp.float32)   # [tm, hidden]
    h1 = jnp.maximum(h1 + b1_ref[...], 0.0)                            # ReLU
    f = jnp.dot(h1, w2_ref[...], preferred_element_type=jnp.float32)   # [tm, out_half]
    f_ref[...] = f + b2_ref[...]


# ---------------------- kernel 2: neighbor sum (tiled dense A @ f) -------------------

def agg_kernel(adj_ref, f_ref, out_ref, acc_ref):
    k = pl.program_id(1)                       # reduction (src-tile) axis, last in grid

    @pl.when(k == 0)
    def _init():
        acc_ref[...] = jnp.zeros_like(acc_ref)

    # [tm, tk] bf16 @ [tk, out_half] bf16 -> f32 accumulation on the MXU.
    acc_ref[...] += jnp.dot(adj_ref[...], f_ref[...],
                            preferred_element_type=jnp.float32)

    @pl.when(k == pl.num_programs(1) - 1)
    def _finalize():
        out_ref[...] = acc_ref[...].astype(out_ref.dtype)


# ------------------------------------ wrapper ---------------------------------------

def wls_mlp_layer(features, adjacency, w1, b1, w2, b2, *, tile_dst=512, tile_src=512):
    """features: [N, in_dim] f32; adjacency: [N, N] f32 with A[dst, src] in {0, 1}."""
    n, in_dim = features.shape
    hidden = w1.shape[1]
    out_half = w2.shape[1]

    # Tile sizes (demo shapes divide evenly; production code would pad N up).
    tm = min(tile_dst, n)
    tk = min(tile_src, n)
    assert n % tm == 0 and n % tk == 0, "N must be a multiple of the tile sizes"

    # ---- pass 1: f = MLP(x), computed once, node-parallel, f32 ----
    f = pl.pallas_call(
        mlp_kernel,
        out_shape=jax.ShapeDtypeStruct((n, out_half), jnp.float32),
        grid_spec=pltpu.PrefetchScalarGridSpec(
            num_scalar_prefetch=0,
            grid=(n // tm,),
            in_specs=[
                pl.BlockSpec((tm, in_dim), lambda i: (i, 0)),
                pl.BlockSpec((in_dim, hidden), lambda i: (0, 0)),
                pl.BlockSpec((1, hidden), lambda i: (0, 0)),
                pl.BlockSpec((hidden, out_half), lambda i: (0, 0)),
                pl.BlockSpec((1, out_half), lambda i: (0, 0)),
            ],
            out_specs=pl.BlockSpec((tm, out_half), lambda i: (i, 0)),
        ),
        compiler_params=pltpu.CompilerParams(
            dimension_semantics=("parallel",),
        ),
    )(features, w1, b1, w2, b2)

    # ---- pass 2: agg = A @ f, tiled (dst, src) reduction, bf16 operands / f32 acc ----
    adj_bf16 = adjacency.astype(jnp.bfloat16)   # lossless: adjacency values are {0, 1}
    f_bf16 = f.astype(jnp.bfloat16)             # halves streamed bytes of f

    cost = pl.CostEstimate(
        flops=2 * n * n * out_half,
        transcendentals=0,
        bytes_accessed=adj_bf16.size * 2 + f_bf16.size * 2 + n * out_half * 4,
    )

    agg = pl.pallas_call(
        agg_kernel,
        out_shape=jax.ShapeDtypeStruct((n, out_half), jnp.float32),
        grid_spec=pltpu.PrefetchScalarGridSpec(
            num_scalar_prefetch=0,
            grid=(n // tm, n // tk),                              # reduction axis last
            in_specs=[
                pl.BlockSpec((tm, tk), lambda i, k: (i, k)),        # adjacency tile
                pl.BlockSpec((tk, out_half), lambda i, k: (k, 0)),  # f tile
            ],
            out_specs=pl.BlockSpec((tm, out_half), lambda i, k: (i, 0)),
            scratch_shapes=[pltpu.VMEM((tm, out_half), jnp.float32)],
        ),
        compiler_params=pltpu.CompilerParams(
            dimension_semantics=("parallel", "arbitrary"),  # dst tiles shard over TCs (v7x)
            vmem_limit_bytes=32 * 1024 * 1024,              # safe on v5e/v6e/v7x
        ),
        cost_estimate=cost,
    )(adj_bf16, f_bf16)

    # Concat in the wrapper (avoids an in-kernel lane-axis concat / extra VMEM copy).
    return jnp.concatenate([f, agg], axis=-1)


def reference(features, adjacency, w1, b1, w2, b2):
    h1 = jnp.maximum(features @ w1 + b1, 0.0)
    f = h1 @ w2 + b2
    agg = adjacency @ f
    return f, agg


if __name__ == "__main__":
    # WLSMLPLayer(in_dim=16, out_dim=32, n_hidden=1, scale_hidden=2,
    #             dropout=0.0, residual=False, aggregation='sum')
    N = 256                              # multiple of the 128 tile -> agg grid (2, 2)
    in_dim = 16
    out_dim = 32
    scale_hidden = 2
    hidden = in_dim * scale_hidden       # 32
    out_half = out_dim // 2              # 16

    key = jax.random.PRNGKey(0)
    k_x, k_adj, k_w1, k_b1, k_w2, k_b2 = jax.random.split(key, 6)

    x = jax.random.normal(k_x, (N, in_dim), dtype=jnp.float32)
    adj = (jax.random.uniform(k_adj, (N, N)) < 0.1).astype(jnp.float32)   # A[dst, src]

    w1 = jax.random.normal(k_w1, (in_dim, hidden), dtype=jnp.float32) / jnp.sqrt(in_dim)
    b1 = jax.random.normal(k_b1, (1, hidden), dtype=jnp.float32) * 0.01
    w2 = jax.random.normal(k_w2, (hidden, out_half), dtype=jnp.float32) / jnp.sqrt(hidden)
    b2 = jax.random.normal(k_b2, (1, out_half), dtype=jnp.float32) * 0.01

    layer = jax.jit(functools.partial(wls_mlp_layer, tile_dst=128, tile_src=128))
    out = layer(x, adj, w1, b1, w2, b2)
    out = jax.block_until_ready(out)
    assert out.shape == (N, out_dim), out.shape

    f_ref, agg_ref = reference(x, adj, w1, b1, w2, b2)

    # f half: pure f32 path -> tight tolerance against the f32 reference.
    f_out = out[:, :out_half]
    assert jnp.allclose(f_out, f_ref, atol=1e-3, rtol=1e-3), "f mismatch vs reference"

    # agg half: the kernel streams f in bf16. Check tightly against a cast-aware
    # reference built from the (already verified) kernel f, and loosely against the
    # pure-f32 reference.
    agg_out = out[:, out_half:]
    agg_ref_bf = adj @ f_out.astype(jnp.bfloat16).astype(jnp.float32)
    assert jnp.allclose(agg_out, agg_ref_bf, atol=1e-3, rtol=1e-3), "agg mismatch (bf16-aware)"
    assert jnp.allclose(agg_out, agg_ref, atol=1e-1, rtol=5e-2), "agg mismatch (f32 ref)"

    # TODO(synk): 'mean' aggregation (divide agg rows by in-degree), dropout>0, and a
    # CSR/gather formulation for large sparse graphs are not implemented here.
    print("KERNEL_OK")
</pallas_src>

<mosaic_0001>
module attributes {stable_mosaic.version = 11 : i64} {
  func.func @mlp_kernel(%arg0: i32, %arg1: memref<128x16xf32, #tpu.memory_space<vmem>>, %arg2: memref<16x32xf32, #tpu.memory_space<vmem>>, %arg3: memref<1x32xf32, #tpu.memory_space<vmem>>, %arg4: memref<32x16xf32, #tpu.memory_space<vmem>>, %arg5: memref<1x16xf32, #tpu.memory_space<vmem>>, %arg6: memref<128x16xf32, #tpu.memory_space<vmem>>) attributes {dimension_semantics = [#tpu.dimension_semantics<parallel>], iteration_bounds = array<i64: 2>, scalar_prefetch = 0 : i64, scratch_operands = 0 : i64, tpu.core_type = #tpu.core_type<tc>, window_params = [{transform_indices = @transform_0, window_bounds = array<i64: 128, 16>}, {pipeline_mode = #tpu.pipeline_mode<synchronous>, transform_indices = @transform_1, window_bounds = array<i64: 16, 32>}, {pipeline_mode = #tpu.pipeline_mode<synchronous>, transform_indices = @transform_2, window_bounds = array<i64: 1, 32>}, {pipeline_mode = #tpu.pipeline_mode<synchronous>, transform_indices = @transform_3, window_bounds = array<i64: 32, 16>}, {pipeline_mode = #tpu.pipeline_mode<synchronous>, transform_indices = @transform_4, window_bounds = array<i64: 1, 16>}, {transform_indices = @transform_5, window_bounds = array<i64: 128, 16>}]} {
    %c0 = arith.constant 0 : index
    %c0_0 = arith.constant 0 : index
    %0 = vector.load %arg1[%c0, %c0_0] : memref<128x16xf32, #tpu.memory_space<vmem>>, vector<128x16xf32>
    %c0_1 = arith.constant 0 : index
    %c0_2 = arith.constant 0 : index
    %1 = vector.load %arg2[%c0_1, %c0_2] : memref<16x32xf32, #tpu.memory_space<vmem>>, vector<16x32xf32>
    %cst = arith.constant dense<0.000000e+00> : vector<128x32xf32>
    %2 = tpu.matmul %0, %1, %cst {dimension_numbers = #tpu.dot_dimension_numbers<[1], [0], [0], [1], [0, 0, 1, 1], [], []>} : vector<128x16xf32>, vector<16x32xf32>, vector<128x32xf32> -> vector<128x32xf32>
    %c0_3 = arith.constant 0 : index
    %c0_4 = arith.constant 0 : index
    %3 = vector.load %arg3[%c0_3, %c0_4] : memref<1x32xf32, #tpu.memory_space<vmem>>, vector<1x32xf32>
    %4 = vector.broadcast %3 : vector<1x32xf32> to vector<128x32xf32>
    %5 = arith.addf %2, %4 : vector<128x32xf32>
    %cst_5 = arith.constant 0.000000e+00 : f32
    %6 = vector.broadcast %cst_5 : f32 to vector<128x32xf32>
    %7 = arith.maximumf %5, %6 : vector<128x32xf32>
    %c0_6 = arith.constant 0 : index
    %c0_7 = arith.constant 0 : index
    %8 = vector.load %arg4[%c0_6, %c0_7] : memref<32x16xf32, #tpu.memory_space<vmem>>, vector<32x16xf32>
    %cst_8 = arith.constant dense<0.000000e+00> : vector<128x16xf32>
    %9 = tpu.matmul %7, %8, %cst_8 {dimension_numbers = #tpu.dot_dimension_numbers<[1], [0], [0], [1], [0, 0, 1, 1], [], []>} : vector<128x32xf32>, vector<32x16xf32>, vector<128x16xf32> -> vector<128x16xf32>
    %c0_9 = arith.constant 0 : index
    %c0_10 = arith.constant 0 : index
    %10 = vector.load %arg5[%c0_9, %c0_10] : memref<1x16xf32, #tpu.memory_space<vmem>>, vector<1x16xf32>
    %11 = vector.broadcast %10 : vector<1x16xf32> to vector<128x16xf32>
    %12 = arith.addf %9, %11 : vector<128x16xf32>
    %c0_11 = arith.constant 0 : index
    %c0_12 = arith.constant 0 : index
    %13 = vector.load %arg6[%c0_11, %c0_12] : memref<128x16xf32, #tpu.memory_space<vmem>>, vector<128x16xf32>
    tpu.vector_store %arg6[%c0_11, %c0_12], %12 {strides = array<i32>} : memref<128x16xf32, #tpu.memory_space<vmem>>, vector<128x16xf32>,
    return
  }
  func.func @transform_0(%arg0: i32) -> (i32, i32) {
    %c0_i32 = arith.constant 0 : i32
    %c0_i32_0 = arith.constant 0 : i32
    return %arg0, %c0_i32 : i32, i32
  }
  func.func @transform_1(%arg0: i32) -> (i32, i32) {
    %c0_i32 = arith.constant 0 : i32
    %c0_i32_0 = arith.constant 0 : i32
    %c0_i32_1 = arith.constant 0 : i32
    return %c0_i32, %c0_i32_0 : i32, i32
  }
  func.func @transform_2(%arg0: i32) -> (i32, i32) {
    %c0_i32 = arith.constant 0 : i32
    %c0_i32_0 = arith.constant 0 : i32
    %c0_i32_1 = arith.constant 0 : i32
    return %c0_i32, %c0_i32_0 : i32, i32
  }
  func.func @transform_3(%arg0: i32) -> (i32, i32) {
    %c0_i32 = arith.constant 0 : i32
    %c0_i32_0 = arith.constant 0 : i32
    %c0_i32_1 = arith.constant 0 : i32
    return %c0_i32, %c0_i32_0 : i32, i32
  }
  func.func @transform_4(%arg0: i32) -> (i32, i32) {
    %c0_i32 = arith.constant 0 : i32
    %c0_i32_0 = arith.constant 0 : i32
    %c0_i32_1 = arith.constant 0 : i32
    return %c0_i32, %c0_i32_0 : i32, i32
  }
  func.func @transform_5(%arg0: i32) -> (i32, i32) {
    %c0_i32 = arith.constant 0 : i32
    %c0_i32_0 = arith.constant 0 : i32
    return %arg0, %c0_i32 : i32, i32
  }
}

module attributes {stable_mosaic.version = 11 : i64} {
  func.func @agg_kernel(%arg0: i32, %arg1: i32, %arg2: memref<128x128xbf16, #tpu.memory_space<vmem>>, %arg3: memref<128x16xbf16, #tpu.memory_space<vmem>>, %arg4: memref<128x16xf32, #tpu.memory_space<vmem>>, %arg5: memref<128x16xf32, #tpu.memory_space<vmem>>) attributes {dimension_semantics = [#tpu.dimension_semantics<parallel>, #tpu.dimension_semantics<arbitrary>], iteration_bounds = array<i64: 2, 2>, scalar_prefetch = 0 : i64, scratch_operands = 1 : i64, tpu.core_type = #tpu.core_type<tc>, window_params = [{transform_indices = @transform_0, window_bounds = array<i64: 128, 128>}, {transform_indices = @transform_1, window_bounds = array<i64: 128, 16>}, {transform_indices = @transform_2, window_bounds = array<i64: 128, 16>}]} {
    %c0_i32 = arith.constant 0 : i32
    %0 = arith.cmpi eq, %arg1, %c0_i32 : i32
    %1 = arith.extui %0 : i1 to i32
    %c0_i32_0 = arith.constant 0 : i32
    %2 = arith.cmpi ne, %1, %c0_i32_0 : i32
    scf.if %2 {
      %cst_9 = arith.constant 0.000000e+00 : f32
      %12 = vector.broadcast %cst_9 : f32 to vector<128x16xf32>
      %c0_10 = arith.constant 0 : index
      %c0_11 = arith.constant 0 : index
      %13 = vector.load %arg5[%c0_10, %c0_11] : memref<128x16xf32, #tpu.memory_space<vmem>>, vector<128x16xf32>
      tpu.vector_store %arg5[%c0_10, %c0_11], %12 {strides = array<i32>} : memref<128x16xf32, #tpu.memory_space<vmem>>, vector<128x16xf32>,
    } else {
    }
    %c0 = arith.constant 0 : index
    %c0_1 = arith.constant 0 : index
    %3 = vector.load %arg5[%c0, %c0_1] : memref<128x16xf32, #tpu.memory_space<vmem>>, vector<128x16xf32>
    %c0_2 = arith.constant 0 : index
    %c0_3 = arith.constant 0 : index
    %4 = vector.load %arg2[%c0_2, %c0_3] : memref<128x128xbf16, #tpu.memory_space<vmem>>, vector<128x128xbf16>
    %c0_4 = arith.constant 0 : index
    %c0_5 = arith.constant 0 : index
    %5 = vector.load %arg3[%c0_4, %c0_5] : memref<128x16xbf16, #tpu.memory_space<vmem>>, vector<128x16xbf16>
    %cst = arith.constant dense<0.000000e+00> : vector<128x16xf32>
    %6 = tpu.matmul %4, %5, %cst {dimension_numbers = #tpu.dot_dimension_numbers<[1], [0], [0], [1], [0, 0, 1, 1], [], []>} : vector<128x128xbf16>, vector<128x16xbf16>, vector<128x16xf32> -> vector<128x16xf32>
    %7 = arith.addf %3, %6 : vector<128x16xf32>
    %c0_6 = arith.constant 0 : index
    %c0_7 = arith.constant 0 : index
    %8 = vector.load %arg5[%c0_6, %c0_7] : memref<128x16xf32, #tpu.memory_space<vmem>>, vector<128x16xf32>
    tpu.vector_store %arg5[%c0_6, %c0_7], %7 {strides = array<i32>} : memref<128x16xf32, #tpu.memory_space<vmem>>, vector<128x16xf32>,
    %c1_i32 = arith.constant 1 : i32
    %9 = arith.cmpi eq, %arg1, %c1_i32 : i32
    %10 = arith.extui %9 : i1 to i32
    %c0_i32_8 = arith.constant 0 : i32
    %11 = arith.cmpi ne, %10, %c0_i32_8 : i32
    scf.if %11 {
      %c0_9 = arith.constant 0 : index
      %c0_10 = arith.constant 0 : index
      %12 = vector.load %arg5[%c0_9, %c0_10] : memref<128x16xf32, #tpu.memory_space<vmem>>, vector<128x16xf32>
      %c0_11 = arith.constant 0 : index
      %c0_12 = arith.constant 0 : index
      %13 = vector.load %arg4[%c0_11, %c0_12] : memref<128x16xf32, #tpu.memory_space<vmem>>, vector<128x16xf32>
      tpu.vector_store %arg4[%c0_11, %c0_12], %12 {strides = array<i32>} : memref<128x16xf32, #tpu.memory_space<vmem>>, vector<128x16xf32>,
    } else {
    }
    return
  }
  func.func @transform_0(%arg0: i32, %arg1: i32) -> (i32, i32) {
    %c0_i32 = arith.constant 0 : i32
    return %arg0, %arg1 : i32, i32
  }
  func.func @transform_1(%arg0: i32, %arg1: i32) -> (i32, i32) {
    %c0_i32 = arith.constant 0 : i32
    %c0_i32_0 = arith.constant 0 : i32
    return %arg1, %c0_i32 : i32, i32
  }
  func.func @transform_2(%arg0: i32, %arg1: i32) -> (i32, i32) {
    %c0_i32 = arith.constant 0 : i32
    %c0_i32_0 = arith.constant 0 : i32
    return %arg0, %c0_i32 : i32, i32
  }
}

</mosaic_0001>

<bundles_post_ra>
// kernel: wls_mlp_layer.3
= control target key start
LH: loop header
LB: loop body
LE: loop exit
PB: predicated region body
PF: predicated region fallthrough
CT: control target
= control target key end

     0   :  { %s911_s9 = smov 0   ;;  %s913_s10 = smov 0   ;;  %s1109_s0 = inlined_call_operand.vmem [shape: bf16[256,256], index: 0, kind: input, shape index: {}]   ;;  %s1110_s1 = inlined_call_operand.vmem [shape: bf16[256,16], index: 1, kind: input, shape index: {}]   ;;  %s1111_s2 = inlined_call_operand.vmem [shape: f32[256,16], index: 2, kind: output, shape index: {}]  }
   0x1   :  { %s915_s11 = smov 0   ;;  %s917_s12 = smov 0  }
   0x2   :  { %s919_s13 = smov 0   ;;  %s921_s14 = smov 0  }
   0x3   :  { %s923_s15 = smov 0  }
   0x4 LB: > { %s21_s16 = sadd.s32 1, %s885_s13  ;;  %s24_s17 = sadd.s32 1, %s889_s14  ;;  %s893_s15 = sphi %s923_s15, %s12_s15   ;;  %s889_s14 = sphi %s921_s14, %s1117_s14   ;;  %s885_s13 = sphi %s919_s13, %s1116_s13   ;;  %s881_s12 = sphi %s917_s12, %s1115_s12   ;;  %s877_s11 = sphi %s915_s11, %s1114_s11   ;;  %s873_s10 = sphi %s913_s10, %s1113_s10   ;;  %s869_s9 = sphi %s911_s9, %s1112_s9  }
   0x5   : > { %p22_p0 = scmp.ge.s32.totalorder %s21_s16, 2  ;;  %p40_p1 = scmp.ne.s32.totalorder %s873_s10, %s869_s9 }
   0x6   : > { %p41_p2 = scmp.eq.s32.totalorder %s893_s15, 0  ;;  %s33_s21 = sadd.s32 1, %s873_s10 }
   0x7   : > { %s1119_s16 = smov (%p22_p0, %s21_s16), 0  ;;  %s1121_s17 = smov (!%p22_p0, %s24_s17), %s889_s14 }
   0x8   : > { %p42_p3 = por %p41_p2, %p40_p1  ;;  %p26_p4 = scmp.ge.s32.totalorder %s1121_s17, 2 }
   0x9   : > { %s29_s18 = ssub.s32 %s885_s13, %s1119_s16  ;;  %p662_p6 = scmp.ge.s32.totalorder %s893_s15, 4 }
   0xa   : > { %s1123_s17 = smov (%p26_p4, %s1121_s17), 0 }
   0xb   : > { %s28_s19 = ssub.s32 %s889_s14, %s1123_s17  ;;  %118 = sbr.rel (%p662_p6) target bundleno = 38 (0x26), region = 16 }
   0xc   : > { %s30_s20 = sor.u32 %s29_s18, %s28_s19 }
   0xd   : > { %p31_p5 = scmp.eq.s32.totalorder %s30_s20, 0 }
   0xf   : > { %s962_s22 = scalar_select %p31_p5, %s873_s10, %s33_s21  }
  0x10   : > { %121 = sbr.rel (!%p42_p3) target bundleno = 38 (0x26), region = 20  ;;  %s123_s23 = sand.u32 (%p42_p3), 1, %s873_s10  }
  0x11   : > { %s741_s24 = sshll.u32 (%p42_p3), %s889_s14, 5  ;;  %s663_s25 = sshll.u32 (%p42_p3), %s123_s23, 6 }
  0x12   : > { %s128_s26 = sadd.s32 (%p42_p3), %s885_s13, %s741_s24  ;;  %s125_s3 = scalar_lea.vmem (%p42_p3), [#allocation3], %s663_s25 }
  0x13   : > { %s666_s27 = sshll.u32 (%p42_p3), %s128_s26, 2 }
  0x14   : > { %s971_s30 = scalar_lea.vmem (%p42_p3), %s1109_s0, %s666_s27 }
  0x15   : > { %v147_v0 = vld [vmem:[%s971_s30] sm:$0xf]  ;;  %v149_v1 = vld [vmem:[%s971_s30 + $0x8] sm:$0xf]  ;;  %v151_v2 = vld [vmem:[%s971_s30 + $0x10] sm:$0xf] }
  0x16   : > { %148 = vst [vmem:[%s125_s3] sm:$0xf] %v147_v0  ;;  %v153_v3 = vld [vmem:[%s971_s30 + $0x18] sm:$0xf]  ;;  %v155_v4 = vld [vmem:[%s971_s30 + $0x20] sm:$0xf] }
  0x17   : > { %150 = vst [vmem:[%s125_s3 + $0x4] sm:$0xf] %v149_v1  ;;  %v157_v5 = vld [vmem:[%s971_s30 + $0x28] sm:$0xf]  ;;  %v159_v6 = vld [vmem:[%s971_s30 + $0x30] sm:$0xf] }
  0x18   : > { %152 = vst [vmem:[%s125_s3 + $0x8] sm:$0xf] %v151_v2  ;;  %v161_v7 = vld [vmem:[%s971_s30 + $0x38] sm:$0xf]  ;;  %v163_v8 = vld [vmem:[%s971_s30 + $0x40] sm:$0xf] }
  0x19   : > { %154 = vst [vmem:[%s125_s3 + $0xc] sm:$0xf] %v153_v3  ;;  %v165_v9 = vld [vmem:[%s971_s30 + $0x48] sm:$0xf]  ;;  %v167_v10 = vld [vmem:[%s971_s30 + $0x50] sm:$0xf] }
  0x1a   : > { %156 = vst [vmem:[%s125_s3 + $0x10] sm:$0xf] %v155_v4  ;;  %v169_v11 = vld [vmem:[%s971_s30 + $0x58] sm:$0xf]  ;;  %v171_v12 = vld [vmem:[%s971_s30 + $0x60] sm:$0xf] }
  0x1b   : > { %158 = vst [vmem:[%s125_s3 + $0x14] sm:$0xf] %v157_v5  ;;  %v173_v13 = vld [vmem:[%s971_s30 + $0x68] sm:$0xf]  ;;  %v175_v14 = vld [vmem:[%s971_s30 + $0x70] sm:$0xf] }
  0x1c   : > { %160 = vst [vmem:[%s125_s3 + $0x18] sm:$0xf] %v159_v6  ;;  %v177_v15 = vld [vmem:[%s971_s30 + $0x78] sm:$0xf] }
  0x1d   : > { %162 = vst [vmem:[%s125_s3 + $0x1c] sm:$0xf] %v161_v7 }
  0x1e   : > { %164 = vst [vmem:[%s125_s3 + $0x20] sm:$0xf] %v163_v8 }
  0x1f   : > { %166 = vst [vmem:[%s125_s3 + $0x24] sm:$0xf] %v165_v9 }
  0x20   : > { %168 = vst [vmem:[%s125_s3 + $0x28] sm:$0xf] %v167_v10 }
  0x21   : > { %170 = vst [vmem:[%s125_s3 + $0x2c] sm:$0xf] %v169_v11 }
  0x22   : > { %172 = vst [vmem:[%s125_s3 + $0x30] sm:$0xf] %v171_v12 }
  0x23   : > { %174 = vst [vmem:[%s125_s3 + $0x34] sm:$0xf] %v173_v13 }
  0x24   : > { %176 = vst [vmem:[%s125_s3 + $0x38] sm:$0xf] %v175_v14 }
  0x25   : > { %178 = vst [vmem:[%s125_s3 + $0x3c] sm:$0xf] %v177_v15 }
  0x26 PF: > { %p667_p7 = scmp.ge.s32.totalorder %s893_s15, 1  ;;  %p242_p8 = scmp.lt.s32.totalorder %s893_s15, 5 }
  0x28   : > { %p243_p9 = pnand %p667_p7, %p242_p8 }
  0x29   : > { %s249_s4 = sand.u32 (!%p243_p9), 1, %s869_s9   ;;  %s669_s5 = sshll.u32 (!%p243_p9), %s877_s11, 4 }
  0x2a   : > { %246 = sbr.rel (%p243_p9) target bundleno = 282 (0x11a), region = 65  ;;  %s668_s6 = sshll.u32 (!%p243_p9), %s249_s4, 6 }
  0x2b   : > { %p277_p10 = scmp.lt.s32.totalorder (!%p243_p9), %s669_s5, 31  ;;  %s671_s7 = sshll.u32 (!%p243_p9), %s881_s12, 4 }
  0x2c   : > { %p283_p11 = scmp.lt.s32.totalorder (!%p243_p9), %s671_s7, 31  ;;  %s1004_s9 = scalar_lea.vmem (!%p243_p9), [#allocation3], %s668_s6 }
  0x2d   : > { %p673_p12 = scmp.ne.s32.totalorder (!%p243_p9), %s877_s11, 0 }
  0x2f   : > { %s1125_s5 = smov (!%p277_p10, %s669_s5), 31  ;;  %s1127_s7 = smov (!%p283_p11, %s671_s7), 31 }
  0x30   : > { %s670_s8 = sshll.u32 %s1125_s5, 2  ;;  %s672_s21 = sshll.u32 %s1127_s7, 3 }
  0x31   : > { %s997_s20 = scalar_lea.vmem %s1110_s1, %s670_s8  ;;  %s1002_s25 = scalar_lea.vmem %s1111_s2, %s672_s21 }
  0x32   : > { %291 = sbr.rel (%p673_p12) target bundleno = 72 (0x48), region = 73 }
  0x37   : > { %vm292_vm0 = vcmask 130048   ;;  %v895_v16 = vmov 0.0  }
  0x38   : > { %293 = vst.msk [vmem:[#allocation2] sm:$0xff] %vm292_vm0, %v895_v16 }
  0x39   : > { %294 = vst.msk [vmem:[#allocation2 + $0x8] sm:$0xff] %vm292_vm0, %v895_v16 }
  0x3a   : > { %295 = vst.msk [vmem:[#allocation2 + $0x10] sm:$0xff] %vm292_vm0, %v895_v16 }
  0x3b   : > { %296 = vst.msk [vmem:[#allocation2 + $0x18] sm:$0xff] %vm292_vm0, %v895_v16 }
  0x3c   : > { %297 = vst.msk [vmem:[#allocation2 + $0x20] sm:$0xff] %vm292_vm0, %v895_v16 }
  0x3d   : > { %298 = vst.msk [vmem:[#allocation2 + $0x28] sm:$0xff] %vm292_vm0, %v895_v16 }
  0x3e   : > { %299 = vst.msk [vmem:[#allocation2 + $0x30] sm:$0xff] %vm292_vm0, %v895_v16 }
  0x3f   : > { %300 = vst.msk [vmem:[#allocation2 + $0x38] sm:$0xff] %vm292_vm0, %v895_v16 }
  0x40   : > { %301 = vst.msk [vmem:[#allocation2 + $0x40] sm:$0xff] %vm292_vm0, %v895_v16 }
  0x41   : > { %302 = vst.msk [vmem:[#allocation2 + $0x48] sm:$0xff] %vm292_vm0, %v895_v16 }
  0x42   : > { %303 = vst.msk [vmem:[#allocation2 + $0x50] sm:$0xff] %vm292_vm0, %v895_v16 }
  0x43   : > { %304 = vst.msk [vmem:[#allocation2 + $0x58] sm:$0xff] %vm292_vm0, %v895_v16 }
  0x44   : > { %305 = vst.msk [vmem:[#allocation2 + $0x60] sm:$0xff] %vm292_vm0, %v895_v16 }
  0x45   : > { %306 = vst.msk [vmem:[#allocation2 + $0x68] sm:$0xff] %vm292_vm0, %v895_v16 }
  0x46   : > { %307 = vst.msk [vmem:[#allocation2 + $0x70] sm:$0xff] %vm292_vm0, %v895_v16 }
  0x47   : > { %308 = vst.msk [vmem:[#allocation2 + $0x78] sm:$0xff] %vm292_vm0, %v895_v16 }
  0x48 PF: > { %v757_v17 = vld [vmem:[%s997_s20 + $0x38] sm:$0xff]  ;;  %v756_v18 = vld [vmem:[%s997_s20 + $0x30] sm:$0xff]  ;;  %v755_v19 = vld [vmem:[%s997_s20 + $0x28] sm:$0xff]  ;;  %vm518_vm1 = vcmask 130048   ;;  %p738_p13 = scmp.ne.s32.totalorder %s877_s11, 1 }
  0x49   : > { %453 = vmatpush.bf16.msra.mxu0 %v757_v17  ;;  %758 = vmatpush.bf16.msra.mxu1 %v757_v17  ;;  %v754_v20 = vld [vmem:[%s997_s20 + $0x20] sm:$0xff]  ;;  %v753_v21 = vld [vmem:[%s997_s20 + $0x18] sm:$0xff]  ;;  %v752_v22 = vld [vmem:[%s997_s20 + $0x10] sm:$0xff] }
  0x4a   : > { %759 = vmatpush.bf16.msra.mxu2 %v757_v17  ;;  %760 = vmatpush.bf16.msra.mxu3 %v757_v17  ;;  %v751_v23 = vld [vmem:[%s997_s20 + $0x8] sm:$0xff]  ;;  %v750_v24 = vld [vmem:[%s997_s20] sm:$0xff]  ;;  %v744_v26 = vld [vmem:[%s1004_s9 + $0x10] sm:$0xff] }
  0x4b   : > { %v742_v25 = vld [vmem:[%s1004_s9] sm:$0xff]  ;;  %v748_v28 = vld [vmem:[%s1004_s9 + $0x30] sm:$0xff]  ;;  %v743_v29 = vld [vmem:[%s1004_s9 + $0x8] sm:$0xff] }
  0x4c   : > { %v746_v27 = vld [vmem:[%s1004_s9 + $0x20] sm:$0xff]  ;;  %v745_v30 = vld [vmem:[%s1004_s9 + $0x18] sm:$0xff]  ;;  %v747_v31 = vld [vmem:[%s1004_s9 + $0x28] sm:$0xff] }
  0x4d   : > { %454 = vmatpush.bf16.msra.mxu0 %v756_v18  ;;  %761 = vmatpush.bf16.msra.mxu1 %v756_v18  ;;  %v749_v32 = vld [vmem:[%s1004_s9 + $0x38] sm:$0xff]  ;;  %v309_v33 = vld [vmem:[#allocation2] sm:$0xff]  ;;  %v310_v41 = vld [vmem:[#allocation2 + $0x8] sm:$0xff] }
  0x4e   : > { %762 = vmatpush.bf16.msra.mxu2 %v756_v18  ;;  %763 = vmatpush.bf16.msra.mxu3 %v756_v18  ;;  %v313_v34 = vld [vmem:[#allocation2 + $0x20] sm:$0xff]  ;;  %v314_v42 = vld [vmem:[#allocation2 + $0x28] sm:$0xff]  ;;  %v311_v53 = vld [vmem:[#allocation2 + $0x10] sm:$0xff] }
  0x4f   : > { %v317_v39 = vld [vmem:[#allocation2 + $0x40] sm:$0xff]  ;;  %v318_v51 = vld [vmem:[#allocation2 + $0x48] sm:$0xff]  ;;  %v315_v54 = vld [vmem:[#allocation2 + $0x30] sm:$0xff] }
  0x50   : > { %v321_v40 = vld [vmem:[#allocation2 + $0x60] sm:$0xff]  ;;  %v322_v52 = vld [vmem:[#allocation2 + $0x68] sm:$0xff]  ;;  %v319_v63 = vld [vmem:[#allocation2 + $0x50] sm:$0xff] }
  0x51   : > { %455 = vmatpush.bf16.msra.mxu0 %v755_v19  ;;  %764 = vmatpush.bf16.msra.mxu1 %v755_v19  ;;  %v323_v0 = vld [vmem:[#allocation2 + $0x70] sm:$0xff]  ;;  %v312_v1 = vld [vmem:[#allocation2 + $0x18] sm:$0xff] }
  0x52   : > { %765 = vmatpush.bf16.msra.mxu2 %v755_v19  ;;  %766 = vmatpush.bf16.msra.mxu3 %v755_v19  ;;  %v316_v2 = vld [vmem:[#allocation2 + $0x38] sm:$0xff] }
  0x53   : > { %v320_v11 = vld [vmem:[#allocation2 + $0x58] sm:$0xff] }
  0x54   : > { %v324_v12 = vld [vmem:[#allocation2 + $0x78] sm:$0xff] }
  0x55   : > { %456 = vmatpush.bf16.msra.mxu0 %v754_v20  ;;  %767 = vmatpush.bf16.msra.mxu1 %v754_v20 }
  0x56   : > { %768 = vmatpush.bf16.msra.mxu2 %v754_v20  ;;  %769 = vmatpush.bf16.msra.mxu3 %v754_v20 }
  0x59   : > { %457 = vmatpush.bf16.msra.mxu0 %v753_v21  ;;  %770 = vmatpush.bf16.msra.mxu1 %v753_v21 }
  0x5a   : > { %771 = vmatpush.bf16.msra.mxu2 %v753_v21  ;;  %772 = vmatpush.bf16.msra.mxu3 %v753_v21 }
  0x5d   : > { %458 = vmatpush.bf16.msra.mxu0 %v752_v22  ;;  %773 = vmatpush.bf16.msra.mxu1 %v752_v22 }
  0x5e   : > { %774 = vmatpush.bf16.msra.mxu2 %v752_v22  ;;  %775 = vmatpush.bf16.msra.mxu3 %v752_v22 }
  0x61   : > { %459 = vmatpush.bf16.msra.mxu0 %v751_v23  ;;  %776 = vmatpush.bf16.msra.mxu1 %v751_v23 }
  0x62   : > { %777 = vmatpush.bf16.msra.mxu2 %v751_v23  ;;  %778 = vmatpush.bf16.msra.mxu3 %v751_v23 }
  0x65   : > { %460 = vmatpush.bf16.msra.mxu0 %v750_v24  ;;  %779 = vmatpush.bf16.msra.mxu1 %v750_v24 }
  0x66   : > { %780 = vmatpush.bf16.msra.mxu2 %v750_v24  ;;  %781 = vmatpush.bf16.msra.mxu3 %v750_v24 }
  0x68   : > { %461 = vmatmul.bf16.vlgmr.msra.gmra.mxu0 %v742_v25  ;;  %471 = vmatmul.bf16.vlgmr.msra.gmra.mxu1 %v744_v26 }
  0x69   : > { %481 = vmatmul.bf16.vlgmr.msra.gmra.mxu2 %v746_v27  ;;  %491 = vmatmul.bf16.vlgmr.msra.gmra.mxu3 %v748_v28 }
  0x78   : > { %466 = vmatmul.bf16.gmra.mxu0 %v743_v29  ;;  %476 = vmatmul.bf16.gmra.mxu1 %v745_v30 }
  0x79   : > { %486 = vmatmul.bf16.gmra.mxu2 %v747_v31  ;;  %496 = vmatmul.bf16.gmra.mxu3 %v749_v32 }
  0xe5   : > { %v462_v35 = vpop.f32.mrf.mxu0  ;;  %v472_v36 = vpop.f32.mrf.mxu1 }
  0xe6   : > { %v502_v37 = vadd.f32 %v462_v35, %v309_v33  ;;  %v506_v38 = vadd.f32 %v472_v36, %v313_v34 }
  0xe8   : > { %519 = vst.msk [vmem:[#allocation2] sm:$0xff] %vm518_vm1, %v502_v37 }
  0xe9   : > { %523 = vst.msk [vmem:[#allocation2 + $0x20] sm:$0xff] %vm518_vm1, %v506_v38 }
  0xec   : > { %v482_v43 = vpop.f32.mrf.mxu2  ;;  %v492_v44 = vpop.f32.mrf.mxu3 }
  0xed   : > { %v510_v45 = vadd.f32 %v482_v43, %v317_v39  ;;  %v514_v46 = vadd.f32 %v492_v44, %v321_v40  ;;  %v464_v47 = vpop.f32.mrf.mxu0  ;;  %v474_v48 = vpop.f32.mrf.mxu1 }
  0xee   : > { %v503_v49 = vadd.f32 %v464_v47, %v310_v41  ;;  %v507_v50 = vadd.f32 %v474_v48, %v314_v42 }
  0xef   : > { %527 = vst.msk [vmem:[#allocation2 + $0x40] sm:$0xff] %vm518_vm1, %v510_v45 }
  0xf0   : > { %531 = vst.msk [vmem:[#allocation2 + $0x60] sm:$0xff] %vm518_vm1, %v514_v46 }
  0xf1   : > { %520 = vst.msk [vmem:[#allocation2 + $0x8] sm:$0xff] %vm518_vm1, %v503_v49 }
  0xf2   : > { %524 = vst.msk [vmem:[#allocation2 + $0x28] sm:$0xff] %vm518_vm1, %v507_v50 }
  0xf4   : > { %v484_v55 = vpop.f32.mrf.mxu2  ;;  %v494_v56 = vpop.f32.mrf.mxu3 }
  0xf5   : > { %v511_v57 = vadd.f32 %v484_v55, %v318_v51  ;;  %v515_v58 = vadd.f32 %v494_v56, %v322_v52  ;;  %v467_v59 = vpop.f32.mrf.mxu0  ;;  %v477_v60 = vpop.f32.mrf.mxu1 }
  0xf6   : > { %v504_v61 = vadd.f32 %v467_v59, %v311_v53  ;;  %v508_v62 = vadd.f32 %v477_v60, %v315_v54 }
  0xf7   : > { %528 = vst.msk [vmem:[#allocation2 + $0x48] sm:$0xff] %vm518_vm1, %v511_v57 }
  0xf8   : > { %532 = vst.msk [vmem:[#allocation2 + $0x68] sm:$0xff] %vm518_vm1, %v515_v58 }
  0xf9   : > { %521 = vst.msk [vmem:[#allocation2 + $0x10] sm:$0xff] %vm518_vm1, %v504_v61 }
  0xfa   : > { %525 = vst.msk [vmem:[#allocation2 + $0x30] sm:$0xff] %vm518_vm1, %v508_v62 }
  0xfc   : > { %v487_v3 = vpop.f32.mrf.mxu2  ;;  %v497_v4 = vpop.f32.mrf.mxu3 }
  0xfd   : > { %v512_v5 = vadd.f32 %v487_v3, %v319_v63  ;;  %v516_v6 = vadd.f32 %v497_v4, %v323_v0  ;;  %v469_v7 = vpop.f32.mrf.mxu0  ;;  %v479_v8 = vpop.f32.mrf.mxu1 }
  0xfe   : > { %v505_v9 = vadd.f32 %v469_v7, %v312_v1  ;;  %v509_v10 = vadd.f32 %v479_v8, %v316_v2 }
  0xff   : > { %529 = vst.msk [vmem:[#allocation2 + $0x50] sm:$0xff] %vm518_vm1, %v512_v5 }
 0x100   : > { %533 = vst.msk [vmem:[#allocation2 + $0x70] sm:$0xff] %vm518_vm1, %v516_v6 }
 0x101   : > { %522 = vst.msk [vmem:[#allocation2 + $0x18] sm:$0xff] %vm518_vm1, %v505_v9 }
 0x102   : > { %526 = vst.msk [vmem:[#allocation2 + $0x38] sm:$0xff] %vm518_vm1, %v509_v10 }
 0x104   : > { %v489_v13 = vpop.f32.mrf.mxu2  ;;  %v499_v14 = vpop.f32.mrf.mxu3  ;;  %538 = sbr.rel (%p738_p13) target bundleno = 282 (0x11a), region = 77 }
 0x105   : > { %v513_v15 = vadd.f32 %v489_v13, %v320_v11  ;;  %v517_v16 = vadd.f32 %v499_v14, %v324_v12 }
 0x107   : > { %530 = vst.msk [vmem:[#allocation2 + $0x58] sm:$0xff] %vm518_vm1, %v513_v15 }
 0x108   : > { %534 = vst.msk [vmem:[#allocation2 + $0x78] sm:$0xff] %vm518_vm1, %v517_v16 }
 0x109   : > { %v539_v17 = vld [vmem:[#allocation2] sm:$0xff]  ;;  %v540_v18 = vld [vmem:[#allocation2 + $0x8] sm:$0xff]  ;;  %v541_v19 = vld [vmem:[#allocation2 + $0x10] sm:$0xff] }
 0x10a   : > { %555 = vst.msk [vmem:[%s1002_s25] sm:$0xff] %vm518_vm1, %v539_v17  ;;  %v542_v20 = vld [vmem:[#allocation2 + $0x18] sm:$0xff]  ;;  %v543_v21 = vld [vmem:[#allocation2 + $0x20] sm:$0xff]  ;;  %v544_v22 = vld [vmem:[#allocation2 + $0x28] sm:$0xff] }
 0x10b   : > { %556 = vst.msk [vmem:[%s1002_s25 + $0x8] sm:$0xff] %vm518_vm1, %v540_v18  ;;  %v545_v23 = vld [vmem:[#allocation2 + $0x30] sm:$0xff]  ;;  %v546_v24 = vld [vmem:[#allocation2 + $0x38] sm:$0xff]  ;;  %v547_v25 = vld [vmem:[#allocation2 + $0x40] sm:$0xff] }
 0x10c   : > { %557 = vst.msk [vmem:[%s1002_s25 + $0x10] sm:$0xff] %vm518_vm1, %v541_v19  ;;  %v548_v26 = vld [vmem:[#allocation2 + $0x48] sm:$0xff]  ;;  %v549_v27 = vld [vmem:[#allocation2 + $0x50] sm:$0xff]  ;;  %v551_v29 = vld [vmem:[#allocation2 + $0x60] sm:$0xff] }
 0x10d   : > { %558 = vst.msk [vmem:[%s1002_s25 + $0x18] sm:$0xff] %vm518_vm1, %v542_v20  ;;  %v552_v30 = vld [vmem:[#allocation2 + $0x68] sm:$0xff]  ;;  %v553_v31 = vld [vmem:[#allocation2 + $0x70] sm:$0xff] }
 0x10e   : > { %559 = vst.msk [vmem:[%s1002_s25 + $0x20] sm:$0xff] %vm518_vm1, %v543_v21  ;;  %v550_v28 = vld [vmem:[#allocation2 + $0x58] sm:$0xff] }
 0x10f   : > { %560 = vst.msk [vmem:[%s1002_s25 + $0x28] sm:$0xff] %vm518_vm1, %v544_v22  ;;  %v554_v32 = vld [vmem:[#allocation2 + $0x78] sm:$0xff] }
 0x110   : > { %561 = vst.msk [vmem:[%s1002_s25 + $0x30] sm:$0xff] %vm518_vm1, %v545_v23 }
 0x111   : > { %562 = vst.msk [vmem:[%s1002_s25 + $0x38] sm:$0xff] %vm518_vm1, %v546_v24 }
 0x112   : > { %563 = vst.msk [vmem:[%s1002_s25 + $0x40] sm:$0xff] %vm518_vm1, %v547_v25 }
 0x113   : > { %564 = vst.msk [vmem:[%s1002_s25 + $0x48] sm:$0xff] %vm518_vm1, %v548_v26 }
 0x114   : > { %565 = vst.msk [vmem:[%s1002_s25 + $0x50] sm:$0xff] %vm518_vm1, %v549_v27 }
 0x115   : > { %566 = vst.msk [vmem:[%s1002_s25 + $0x58] sm:$0xff] %vm518_vm1, %v550_v28 }
 0x116   : > { %567 = vst.msk [vmem:[%s1002_s25 + $0x60] sm:$0xff] %vm518_vm1, %v551_v29 }
 0x117   : > { %568 = vst.msk [vmem:[%s1002_s25 + $0x68] sm:$0xff] %vm518_vm1, %v552_v30 }
 0x118   : > { %569 = vst.msk [vmem:[%s1002_s25 + $0x70] sm:$0xff] %vm518_vm1, %v553_v31 }
 0x119   : > { %570 = vst.msk [vmem:[%s1002_s25 + $0x78] sm:$0xff] %vm518_vm1, %v554_v32 }
 0x11a PF: > { %s12_s15 = sadd.s32 1, %s893_s15   ;;  %s1112_s9 = smov %s873_s10 }
 0x11b   : > { %p9_p0 = scmp.ge.s32.totalorder %s12_s15, 6   ;;  %s1113_s10 = smov %s962_s22 }
 0x11c   : > { %s1114_s11 = smov %s885_s13  ;;  %s1115_s12 = smov %s889_s14 }
 0x11d   : > { %s1116_s13 = smov %s1119_s16  ;;  %s1117_s14 = smov %s1123_s17 }
 0x11e   :  { %11 = sbr.rel (!%p9_p0) target bundleno = 4 (0x4), region = 115 }

// kernel: wls_mlp_layer.2
= control target key start
LH: loop header
LB: loop body
LE: loop exit
PB: predicated region body
PF: predicated region fallthrough
CT: control target
= control target key end

     0   :  { %10 = vsyncpa [#allocation3], 0  ;;  %s993_s0 = inlined_call_operand.vmem [shape: f32[256,16], index: 0, kind: input, shape index: {}]   ;;  %s994_s1 = inlined_call_operand.hbm [shape: f32[16,32], index: 1, kind: input, shape index: {}]   ;;  %s995_s2 = inlined_call_operand.hbm [shape: f32[1,32], index: 2, kind: input, shape index: {}]   ;;  %s996_s3 = inlined_call_operand.vmem [shape: f32[32,16], index: 3, kind: input, shape index: {}]   ;;  %s997_s4 = inlined_call_operand.vmem [shape: f32[1,16], index: 4, kind: input, shape index: {}]   ;;  %s998_s5 = inlined_call_operand.vmem [shape: f32[256,16], index: 5, kind: output, shape index: {}]  }
   0x1   :  { %11 = vsyncpa [#allocation5], 0  ;;  %s824_s18 = smov 0  }
   0x2 LB: > { %s169_s21 = sshll.u32 %s994_s1, 4  ;;  %s628_s22 = sadd.s32 4294967295, %s788_s18   ;;  %s788_s18 = sphi %s824_s18, %s17_s18   ;;  %s170_s21 = int_to_ptr.hbm [resolvable:$true] %s169_s21 }
   0x3   : > { %p630_p0 = scmp.ge.s32.totalorder %s788_s18, 1  ;;  %p158_p1 = scmp.lt.s32.totalorder %s788_s18, 3 }
   0x4   : > { %p835_p2 = scmp.eq.s32.totalorder %s628_s22, 0  ;;  %s790_s25 = smov [#allocation2]  }
   0x5   : > { %p839_p3 = pnand %p630_p0, %p158_p1  ;;  %s171_s26 = sshll.u32 %s790_s25, 4  ;;  %s172_s26 = int_to_ptr.vmem [resolvable:$true] %s171_s26 }
   0x6   : > { %s184_s29 = sshll.u32 %s995_s2, 4  ;;  %s791_s30 = smov [#allocation4]   ;;  %s185_s29 = int_to_ptr.hbm [resolvable:$true] %s184_s29 }
   0x7   : > { %p689_p4 = pneg %p839_p3  ;;  %s186_s6 = sshll.u32 %s791_s30, 4  ;;  %s187_s6 = int_to_ptr.vmem [resolvable:$true] %s186_s6 }
   0x8   : > { %s792_s7 = smov 128   ;;  %s793_s8 = smov 8  }
   0x9   : > { %p690_p5 = pnand %p835_p2, %p689_p4  ;;  %214 = sbr.rel (%p839_p3) target bundleno = 409 (0x199), region = 40 }
   0xb   : > { %692 = dma.hbm_to_vmem [thread:$0]  (!%p690_p5), %s170_s21, 256, %s172_s26, [#allocation3], %s792_s7, %s792_s7, %s793_s8  }
   0xc   : > { %695 = dma.hbm_to_vmem [thread:$0]  (!%p690_p5), %s185_s29, 16, %s187_s6, [#allocation5]  }
   0xe   : > { %779 = dma.done.wait (%p835_p2), [#allocation3], 256  }
   0xf   : > { %781 = vsyncadd (%p835_p2), [#allocation3], 4294967040 }
  0x10   : > { %783 = dma.done.wait (%p835_p2), [#allocation5], 16  }
  0x11   : > { %785 = vsyncadd (%p835_p2), [#allocation5], 4294967280  ;;  %s637_s9 = sshll.u32 %s628_s22, 4  ;;  %v277_v0 = vld [vmem:[#allocation2 + $0x8] sm:$0xff]  ;;  %v276_v1 = vld [vmem:[#allocation2] sm:$0xff]  ;;  %vm282_vm0 = vcmask 130048  }
  0x12   : > { %p249_p6 = scmp.lt.s32.totalorder %s637_s9, 31  ;;  %345 = vmatpush.msra.mxu0 %v277_v0  ;;  %675 = vmatpush.msra.mxu3 %v277_v0  ;;  %v415_v12 = vld [vmem:[%s996_s3 + $0x18] sm:$0xff]  ;;  %v414_v19 = vld [vmem:[%s996_s3 + $0x10] sm:$0xff]  ;;  %v413_v20 = vld [vmem:[%s996_s3 + $0x8] sm:$0xff]  ;;  %vm420_vm1 = vcmask 261120  }
  0x13   : > { %481 = vmatpush.msra.mxu1 %v415_v12  ;;  %677 = vmatpush.msra.mxu2 %v415_v12  ;;  %v412_v21 = vld [vmem:[%s996_s3] sm:$0xff]  ;;  %v914_v22 = vld [vmem:[#allocation4] ss:$0 sm:$0xff] }
  0x14   : > { %s1002_s9 = smov (!%p249_p6, %s637_s9), 31  ;;  %346 = vmatpush.msra.mxu0 %v276_v1  ;;  %676 = vmatpush.msra.mxu3 %v276_v1 }
  0x15   : > { %s638_s10 = sshll.u32 %s1002_s9, 3  ;;  %482 = vmatpush.msra.mxu1 %v414_v19  ;;  %678 = vmatpush.msra.mxu2 %v414_v19 }
  0x16   : > { %s868_s13 = scalar_lea.vmem %s993_s0, %s638_s10  ;;  %s956_s27 = scalar_lea.vmem %s998_s5, %s638_s10 }
  0x17   : > { %v260_v2 = vld [vmem:[%s868_s13] sm:$0xff]  ;;  %v261_v3 = vld [vmem:[%s868_s13 + $0x8] sm:$0xff]  ;;  %v262_v4 = vld [vmem:[%s868_s13 + $0x10] sm:$0xff]  ;;  %483 = vmatpush.msra.mxu1 %v413_v20  ;;  %679 = vmatpush.msra.mxu2 %v413_v20 }
  0x18   : > { %641 = vmatmul.msk.f32.vlgmr.msra.gmra.mxu0 %vm282_vm0, %v260_v2  ;;  %v263_v5 = vld [vmem:[%s868_s13 + $0x18] sm:$0xff]  ;;  %v264_v6 = vld [vmem:[%s868_s13 + $0x20] sm:$0xff]  ;;  %v269_v7 = vld [vmem:[%s868_s13 + $0x48] sm:$0xff] }
  0x19   : > { %650 = vmatmul.msk.f32.vlgmr.msra.gmra.mxu3 %vm282_vm0, %v269_v7  ;;  %v265_v8 = vld [vmem:[%s868_s13 + $0x28] sm:$0xff]  ;;  %v270_v9 = vld [vmem:[%s868_s13 + $0x50] sm:$0xff]  ;;  %v271_v11 = vld [vmem:[%s868_s13 + $0x58] sm:$0xff]  ;;  %484 = vmatpush.msra.mxu1 %v412_v21 }
  0x1a   : > { %v266_v10 = vld [vmem:[%s868_s13 + $0x30] sm:$0xff]  ;;  %v267_v13 = vld [vmem:[%s868_s13 + $0x38] sm:$0xff]  ;;  %v272_v14 = vld [vmem:[%s868_s13 + $0x60] sm:$0xff]  ;;  %680 = vmatpush.msra.mxu2 %v412_v21 }
  0x1b   : > { %v268_v15 = vld [vmem:[%s868_s13 + $0x40] sm:$0xff]  ;;  %v273_v16 = vld [vmem:[%s868_s13 + $0x68] sm:$0xff]  ;;  %v274_v17 = vld [vmem:[%s868_s13 + $0x70] sm:$0xff] }
  0x1c   : > { %v275_v18 = vld [vmem:[%s868_s13 + $0x78] sm:$0xff]  ;;  %v713_v7 = vld [vmem:[%s997_s4] ss:$0 sm:$0xff] }
  0x20   : > { %642 = vmatmul.msk.f32.gmra.mxu0 %vm282_vm0, %v261_v3 }
  0x21   : > { %651 = vmatmul.msk.f32.gmra.mxu3 %vm282_vm0, %v270_v9 }
  0x28   : > { %643 = vmatmul.msk.f32.gmra.mxu0 %vm282_vm0, %v262_v4 }
  0x29   : > { %652 = vmatmul.msk.f32.gmra.mxu3 %vm282_vm0, %v271_v11 }
  0x30   : > { %644 = vmatmul.msk.f32.gmra.mxu0 %vm282_vm0, %v263_v5 }
  0x31   : > { %653 = vmatmul.msk.f32.gmra.mxu3 %vm282_vm0, %v272_v14 }
  0x38   : > { %645 = vmatmul.msk.f32.gmra.mxu0 %vm282_vm0, %v264_v6 }
  0x39   : > { %654 = vmatmul.msk.f32.gmra.mxu3 %vm282_vm0, %v273_v16 }
  0x40   : > { %646 = vmatmul.msk.f32.gmra.mxu0 %vm282_vm0, %v265_v8 }
  0x41   : > { %655 = vmatmul.msk.f32.gmra.mxu3 %vm282_vm0, %v274_v17 }
  0x48   : > { %647 = vmatmul.msk.f32.gmra.mxu0 %vm282_vm0, %v266_v10 }
  0x49   : > { %656 = vmatmul.msk.f32.gmra.mxu3 %vm282_vm0, %v275_v18 }
  0x50   : > { %648 = vmatmul.msk.f32.gmra.mxu0 %vm282_vm0, %v267_v13 }
  0x58   : > { %649 = vmatmul.msk.f32.gmra.mxu0 %vm282_vm0, %v268_v15 }
  0x95   : > { %v348_v23 = vpop.f32.mrf.mxu0 }
  0x96   : > { %v349_v24 = vadd.f32 %v914_v22, %v348_v23 }
  0x98   : > { %v396_v25 = vmax.f32 %v349_v24, 0.0 }
  0x9a   : > { %657 = vmatmul.msk.f32.vlgmr.msra.gmra.mxu1 %vm420_vm1, %v396_v25 }
  0x9c   : > { %v375_v44 = vpop.f32.mrf.mxu3 }
  0x9d   : > { %v351_v26 = vpop.f32.mrf.mxu0  ;;  %v376_v52 = vadd.f32 %v914_v22, %v375_v44 }
  0x9e   : > { %v352_v27 = vadd.f32 %v914_v22, %v351_v26 }
  0x9f   : > { %v405_v53 = vmax.f32 %v376_v52, 0.0 }
  0xa0   : > { %v397_v28 = vmax.f32 %v352_v27, 0.0 }
  0xa2   : > { %658 = vmatmul.msk.f32.gmra.mxu1 %vm420_vm1, %v397_v28 }
  0xa4   : > { %v378_v49 = vpop.f32.mrf.mxu3 }
  0xa5   : > { %v354_v29 = vpop.f32.mrf.mxu0  ;;  %v379_v55 = vadd.f32 %v914_v22, %v378_v49 }
  0xa6   : > { %v355_v30 = vadd.f32 %v914_v22, %v354_v29 }
  0xa7   : > { %v406_v56 = vmax.f32 %v379_v55, 0.0 }
  0xa8   : > { %v398_v31 = vmax.f32 %v355_v30, 0.0 }
  0xaa   : > { %659 = vmatmul.msk.f32.gmra.mxu1 %vm420_vm1, %v398_v31 }
  0xac   : > { %v381_v54 = vpop.f32.mrf.mxu3 }
  0xad   : > { %v357_v32 = vpop.f32.mrf.mxu0  ;;  %v382_v58 = vadd.f32 %v914_v22, %v381_v54 }
  0xae   : > { %v358_v33 = vadd.f32 %v914_v22, %v357_v32 }
  0xaf   : > { %v407_v59 = vmax.f32 %v382_v58, 0.0 }
  0xb0   : > { %v399_v34 = vmax.f32 %v358_v33, 0.0 }
  0xb2   : > { %660 = vmatmul.msk.f32.gmra.mxu1 %vm420_vm1, %v399_v34 }
  0xb4   : > { %v384_v57 = vpop.f32.mrf.mxu3 }
  0xb5   : > { %v360_v35 = vpop.f32.mrf.mxu0  ;;  %v385_v60 = vadd.f32 %v914_v22, %v384_v57 }
  0xb6   : > { %v361_v36 = vadd.f32 %v914_v22, %v360_v35 }
  0xb7   : > { %v408_v62 = vmax.f32 %v385_v60, 0.0 }
  0xb8   : > { %v400_v37 = vmax.f32 %v361_v36, 0.0 }
  0xba   : > { %661 = vmatmul.msk.f32.gmra.mxu1 %vm420_vm1, %v400_v37 }
  0xbc   : > { %v387_v61 = vpop.f32.mrf.mxu3 }
  0xbd   : > { %v363_v38 = vpop.f32.mrf.mxu0  ;;  %v388_v63 = vadd.f32 %v914_v22, %v387_v61 }
  0xbe   : > { %v364_v39 = vadd.f32 %v914_v22, %v363_v38 }
  0xbf   : > { %v409_v1 = vmax.f32 %v388_v63, 0.0 }
  0xc0   : > { %v401_v40 = vmax.f32 %v364_v39, 0.0 }
  0xc2   : > { %662 = vmatmul.msk.f32.gmra.mxu1 %vm420_vm1, %v401_v40 }
  0xc4   : > { %v390_v0 = vpop.f32.mrf.mxu3 }
  0xc5   : > { %v366_v41 = vpop.f32.mrf.mxu0  ;;  %v391_v2 = vadd.f32 %v914_v22, %v390_v0 }
  0xc6   : > { %v367_v42 = vadd.f32 %v914_v22, %v366_v41 }
  0xc7   : > { %v410_v3 = vmax.f32 %v391_v2, 0.0 }
  0xc8   : > { %v402_v43 = vmax.f32 %v367_v42, 0.0 }
  0xca   : > { %663 = vmatmul.msk.f32.gmra.mxu1 %vm420_vm1, %v402_v43 }
  0xcc   : > { %v393_v4 = vpop.f32.mrf.mxu3 }
  0xcd   : > { %v369_v45 = vpop.f32.mrf.mxu0  ;;  %v394_v5 = vadd.f32 %v914_v22, %v393_v4 }
  0xce   : > { %v370_v46 = vadd.f32 %v914_v22, %v369_v45 }
  0xcf   : > { %v411_v6 = vmax.f32 %v394_v5, 0.0 }
  0xd0   : > { %v403_v47 = vmax.f32 %v370_v46, 0.0 }
  0xd2   : > { %664 = vmatmul.msk.f32.gmra.mxu1 %vm420_vm1, %v403_v47 }
  0xd5   : > { %v372_v48 = vpop.f32.mrf.mxu0 }
  0xd6   : > { %v373_v50 = vadd.f32 %v914_v22, %v372_v48 }
  0xd8   : > { %v404_v51 = vmax.f32 %v373_v50, 0.0 }
  0xda   : > { %665 = vmatmul.msk.f32.vlgmr.msra.gmra.mxu2 %vm420_vm1, %v404_v51 }
  0xe2   : > { %666 = vmatmul.msk.f32.gmra.mxu2 %vm420_vm1, %v405_v53 }
  0xea   : > { %667 = vmatmul.msk.f32.gmra.mxu2 %vm420_vm1, %v406_v56 }
  0xf2   : > { %668 = vmatmul.msk.f32.gmra.mxu2 %vm420_vm1, %v407_v59 }
  0xfa   : > { %669 = vmatmul.msk.f32.gmra.mxu2 %vm420_vm1, %v408_v62 }
 0x102   : > { %670 = vmatmul.msk.f32.gmra.mxu2 %vm420_vm1, %v409_v1 }
 0x10a   : > { %671 = vmatmul.msk.f32.gmra.mxu2 %vm420_vm1, %v410_v3 }
 0x112   : > { %672 = vmatmul.msk.f32.gmra.mxu2 %vm420_vm1, %v411_v6 }
 0x117   : > { %v486_v8 = vpop.f32.mrf.mxu1 }
 0x118   : > { %v487_v9 = vadd.f32 %v713_v7, %v486_v8 }
 0x11a   : > { %534 = vst.msk [vmem:[%s956_s27] sm:$0xff] %vm282_vm0, %v487_v9 }
 0x11f   : > { %v489_v10 = vpop.f32.mrf.mxu1 }
 0x120   : > { %v490_v11 = vadd.f32 %v713_v7, %v489_v10 }
 0x122   : > { %535 = vst.msk [vmem:[%s956_s27 + $0x8] sm:$0xff] %vm282_vm0, %v490_v11 }
 0x127   : > { %v492_v12 = vpop.f32.mrf.mxu1 }
 0x128   : > { %v493_v13 = vadd.f32 %v713_v7, %v492_v12 }
 0x12a   : > { %536 = vst.msk [vmem:[%s956_s27 + $0x10] sm:$0xff] %vm282_vm0, %v493_v13 }
 0x12f   : > { %v495_v14 = vpop.f32.mrf.mxu1 }
 0x130   : > { %v496_v15 = vadd.f32 %v713_v7, %v495_v14 }
 0x132   : > { %537 = vst.msk [vmem:[%s956_s27 + $0x18] sm:$0xff] %vm282_vm0, %v496_v15 }
 0x137   : > { %v498_v16 = vpop.f32.mrf.mxu1 }
 0x138   : > { %v499_v17 = vadd.f32 %v713_v7, %v498_v16 }
 0x13a   : > { %538 = vst.msk [vmem:[%s956_s27 + $0x20] sm:$0xff] %vm282_vm0, %v499_v17 }
 0x13f   : > { %v501_v18 = vpop.f32.mrf.mxu1 }
 0x140   : > { %v502_v19 = vadd.f32 %v713_v7, %v501_v18 }
 0x142   : > { %539 = vst.msk [vmem:[%s956_s27 + $0x28] sm:$0xff] %vm282_vm0, %v502_v19 }
 0x147   : > { %v504_v20 = vpop.f32.mrf.mxu1 }
 0x148   : > { %v505_v21 = vadd.f32 %v713_v7, %v504_v20 }
 0x14a   : > { %540 = vst.msk [vmem:[%s956_s27 + $0x30] sm:$0xff] %vm282_vm0, %v505_v21 }
 0x14f   : > { %v507_v22 = vpop.f32.mrf.mxu1 }
 0x150   : > { %v508_v23 = vadd.f32 %v713_v7, %v507_v22 }
 0x152   : > { %541 = vst.msk [vmem:[%s956_s27 + $0x38] sm:$0xff] %vm282_vm0, %v508_v23 }
 0x15d   : > { %v510_v24 = vpop.f32.mrf.mxu2 }
 0x15e   : > { %v511_v25 = vadd.f32 %v713_v7, %v510_v24 }
 0x160   : > { %542 = vst.msk [vmem:[%s956_s27 + $0x40] sm:$0xff] %vm282_vm0, %v511_v25 }
 0x165   : > { %v513_v26 = vpop.f32.mrf.mxu2 }
 0x166   : > { %v514_v27 = vadd.f32 %v713_v7, %v513_v26 }
 0x168   : > { %543 = vst.msk [vmem:[%s956_s27 + $0x48] sm:$0xff] %vm282_vm0, %v514_v27 }
 0x16d   : > { %v516_v28 = vpop.f32.mrf.mxu2 }
 0x16e   : > { %v517_v29 = vadd.f32 %v713_v7, %v516_v28 }
 0x170   : > { %544 = vst.msk [vmem:[%s956_s27 + $0x50] sm:$0xff] %vm282_vm0, %v517_v29 }
 0x175   : > { %v519_v30 = vpop.f32.mrf.mxu2 }
 0x176   : > { %v520_v31 = vadd.f32 %v713_v7, %v519_v30 }
 0x178   : > { %545 = vst.msk [vmem:[%s956_s27 + $0x58] sm:$0xff] %vm282_vm0, %v520_v31 }
 0x17d   : > { %v522_v32 = vpop.f32.mrf.mxu2 }
 0x17e   : > { %v523_v33 = vadd.f32 %v713_v7, %v522_v32 }
 0x180   : > { %546 = vst.msk [vmem:[%s956_s27 + $0x60] sm:$0xff] %vm282_vm0, %v523_v33 }
 0x185   : > { %v525_v34 = vpop.f32.mrf.mxu2 }
 0x186   : > { %v526_v35 = vadd.f32 %v713_v7, %v525_v34 }
 0x188   : > { %547 = vst.msk [vmem:[%s956_s27 + $0x68] sm:$0xff] %vm282_vm0, %v526_v35 }
 0x18d   : > { %v528_v36 = vpop.f32.mrf.mxu2 }
 0x18e   : > { %v529_v37 = vadd.f32 %v713_v7, %v528_v36 }
 0x190   : > { %548 = vst.msk [vmem:[%s956_s27 + $0x70] sm:$0xff] %vm282_vm0, %v529_v37 }
 0x195   : > { %v531_v38 = vpop.f32.mrf.mxu2 }
 0x196   : > { %v532_v39 = vadd.f32 %v713_v7, %v531_v38 }
 0x198   : > { %549 = vst.msk [vmem:[%s956_s27 + $0x78] sm:$0xff] %vm282_vm0, %v532_v39 }
 0x199 PF: > { %s17_s18 = sadd.s32 1, %s788_s18  }
 0x19a   : > { %p14_p7 = scmp.ge.s32.totalorder %s17_s18, 4  }
 0x19c   :  { %16 = sbr.rel (!%p14_p7) target bundleno = 2 (0x2), region = 79 }
 0x1a1   :  { %572 = vsyncpa [#allocation3], 1 }
 0x1a2   :  { %574 = vsyncpa [#allocation3 + $0x1], 1 }
 0x1a3   :  { %575 = vsyncpa [#allocation5], 1 }

</bundles_post_ra>
